<compile_context>
chip_gen: v7x
topology: tpu7x:2x2x1
jax: 0.10.0
libtpu: 0.0.40
codegen_flags: <defaults>
</compile_context>

<pallas_src>
import functools

import jax
import jax.numpy as jnp
from jax.experimental import pallas as pl
from jax.experimental.pallas import tpu as pltpu

# Tiling policy.
_MAX_TILE_ROWS = 1024   # mem-bound: ~512-1K-row tiles already sit at the HBM roofline
_MIN_TILES = 8          # aim for >= 8 grid steps: DMA overlap + v7x 2-TC sharding
_NUM_F32_TEMPS = 4      # full-tile f32 intermediates live in the body (a, e, elem, slack)


def _ce_loss_kernel(a_ref, t_ref, o_ref, *, total_rows: int, needs_mask: bool):
    """One batch tile: partial (un-normalized) loss -> lane-dense (8,128) slab."""
    a = a_ref[...].astype(jnp.float32)                   # (TB, C)
    tb = a.shape[0]

    # Numerically-stable softmax pieces over the class (lane) axis.
    m = jnp.max(a, axis=1, keepdims=True)                # (TB, 1)  XLU cross-lane max
    e = jnp.exp(a - m)                                   # (TB, C)  EUP, per element
    s = jnp.sum(e, axis=1, keepdims=True)                # (TB, 1)  XLU cross-lane sum
    log_s = jnp.log(s)                                   # (TB, 1)  EUP, per ROW only

    # log(p + 1e-6) = log(e/s + 1e-6) = log(e + 1e-6*s) - log(s).
    # Exact PyTorch epsilon semantics, but no per-element reciprocal/divide;
    # per-element EUP work is just the exp above and this log.
    log_p_eps = jnp.log(e + 1e-6 * s) - log_s            # (TB, C)

    # Upcast targets only at the final multiply so the f32 copy of t never
    # lives across the softmax (VMEM pressure / spill avoidance).
    elem = log_p_eps * t_ref[...].astype(jnp.float32)    # (TB, C)

    row_loss = jnp.sum(elem, axis=1, keepdims=True)      # (TB, 1)

    if needs_mask:
        # Only built when B % TB != 0: the final tile reads padded rows; mask
        # them at the cheap (TB, 1) per-row level so NaN/garbage from padding
        # cannot leak into the sum.  (Relies on Pallas padding out-of-range
        # block rows rather than shifting the block start — pinned by Case 2.)
        i = pl.program_id(0)
        row = i * tb + jax.lax.broadcasted_iota(jnp.int32, (tb, 1), 0)
        row_loss = jnp.where(row < total_rows, row_loss, 0.0)

    partial = -jnp.sum(row_loss)                          # per-tile partial (not /B yet)

    # Lane-dense (1, 8, 128) slab per tile -> unmasked vector store; the
    # wrapper reads [:, 0, 0].  Keeps the batch grid axis "parallel".
    o_ref[...] = jnp.broadcast_to(partial, (1, 8, 128))


def _vmem_capacity_bytes(default: int = 64 << 20) -> int:
    """Best-effort VMEM capacity query (v5e/v6e: 128 MiB, v7x: 64 MiB)."""
    try:
        return int(pltpu.get_tpu_info().vmem_capacity_bytes)
    except Exception:
        return default


def ce_loss(assignments: jax.Array, targets: jax.Array, *,
            tile_rows: int | None = None,
            buffer_count: int = 2) -> jax.Array:
    """assignments, targets: (B, C) (f32 or bf16). Returns scalar f32 loss."""
    B, C = assignments.shape
    assert targets.shape == (B, C)

    ia = jnp.dtype(assignments.dtype).itemsize
    it = jnp.dtype(targets.dtype).itemsize

    # Sublane packing multiple of the narrower input dtype (8 f32, 16 bf16, 32 i8).
    sub = max(8, 8 * (4 // min(ia, it, 4)))

    cap = _vmem_capacity_bytes()                 # 128 MiB v5e/v6e, 64 MiB v7x

    # VMEM cost of ONE tile row: pipelined input buffers PLUS the full-tile
    # f32 intermediates the kernel body materializes.
    bytes_per_row = buffer_count * C * (ia + it) + _NUM_F32_TEMPS * C * 4

    # Keep everything comfortably under ~40% of physical VMEM.
    budget = int(cap * 2 // 5)
    if sub * bytes_per_row > budget:
        # TODO(synk): add a class-axis-chunked (online-softmax) second grid axis
        # for very large C; for now fail loudly instead of a silent Mosaic OOM.
        raise ValueError(
            f"C={C} too large for single-axis batch tiling on this chip "
            f"(min tile needs {sub * bytes_per_row} B, budget {budget} B)")

    tb_cap = (budget // bytes_per_row) // sub * sub
    tb_cap = max(sub, min(tb_cap, _MAX_TILE_ROWS))   # mem-bound: huge tiles buy nothing

    if tile_rows is not None:
        TB = int(tile_rows)
        assert TB == B or TB % sub == 0, (
            f"tile_rows must be B or a multiple of {sub} for these dtypes")
    elif B <= tb_cap and B < _MIN_TILES * sub:
        # Tiny batch: single full-dim tile (nothing worth pipelining/sharding).
        TB = B
    else:
        # Aim for >= _MIN_TILES grid steps so next-tile DMA hides under compute
        # and both v7x TensorCores get work; never below one packed sublane group.
        TB = min(tb_cap, max(sub, (B // _MIN_TILES) // sub * sub))

    num_tiles = (B + TB - 1) // TB
    needs_mask = (B % TB) != 0

    # Right-size the scoped VMEM limit to the actual footprint (+ headroom)
    # instead of requesting 3/4 of the chip (matters on v7x's 64 MiB).
    footprint = TB * bytes_per_row + 2 * (8 * 128 * 4)
    vmem_limit_bytes = min(int(cap * 3 // 4), max(2 * footprint, 16 << 20))

    kernel = functools.partial(_ce_loss_kernel, total_rows=B, needs_mask=needs_mask)

    spec_kwargs = {}
    if buffer_count != 2:
        # v5e knob: deeper input pipeline if the per-tile DMA isn't fully hidden
        # under exp/log work at small tiles (sweep 2 vs 3).
        spec_kwargs = dict(pipeline_mode=pl.Buffered(buffer_count))
    in_spec = pl.BlockSpec((TB, C), lambda i: (i, 0), **spec_kwargs)

    partials = pl.pallas_call(
        kernel,
        out_shape=jax.ShapeDtypeStruct((num_tiles, 8, 128), jnp.float32),
        grid_spec=pltpu.PrefetchScalarGridSpec(
            num_scalar_prefetch=0,
            grid=(num_tiles,),
            in_specs=[in_spec, in_spec],
            out_specs=pl.BlockSpec((1, 8, 128), lambda i: (i, 0, 0)),
        ),
        compiler_params=pltpu.CompilerParams(
            dimension_semantics=("parallel",),       # 2 TCs on v7x can split tiles
            vmem_limit_bytes=vmem_limit_bytes,
        ),
    )(assignments, targets)

    # Tiny final reduction (num_tiles values) + normalization in plain XLA.
    return jnp.sum(partials[:, 0, 0]) / jnp.float32(B)


def ce_loss_ref(assignments: jax.Array, targets: jax.Array) -> jax.Array:
    """Pure-JAX reference mirroring the PyTorch forward."""
    B = assignments.shape[0]
    p = jax.nn.softmax(assignments.astype(jnp.float32), axis=1)
    return jnp.sum(-jnp.log(p + 1e-6) * targets.astype(jnp.float32)) / B


if __name__ == "__main__":
    key = jax.random.PRNGKey(0)
    k1, k2, k3, k4, k5, k6 = jax.random.split(key, 6)

    # --- Case 1: small f32 problem (single full-dim tile path) --------------
    B, C = 8, 32
    assignments = jax.random.normal(k1, (B, C), dtype=jnp.float32)
    targets = jax.nn.softmax(jax.random.normal(k2, (B, C), dtype=jnp.float32),
                             axis=1)
    loss = jax.block_until_ready(ce_loss(assignments, targets))
    ref = jax.block_until_ready(ce_loss_ref(assignments, targets))
    assert jnp.allclose(loss, ref, rtol=1e-5, atol=1e-5), (loss, ref)

    # --- Case 2: multi-tile path with a ragged last tile (masking check) ----
    B2, C2 = 20, 32
    a2 = jax.random.normal(k3, (B2, C2), dtype=jnp.float32)
    t2 = jax.nn.softmax(jax.random.normal(k4, (B2, C2), dtype=jnp.float32),
                        axis=1)
    loss2 = jax.block_until_ready(ce_loss(a2, t2, tile_rows=8))  # 3 tiles, last masked
    ref2 = jax.block_until_ready(ce_loss_ref(a2, t2))
    assert jnp.allclose(loss2, ref2, rtol=1e-5, atol=1e-5), (loss2, ref2)

    # --- Case 3: bf16 inputs (half the HBM traffic), f32 math in-kernel -----
    a_bf = assignments.astype(jnp.bfloat16)
    t_bf = targets.astype(jnp.bfloat16)
    loss_bf = jax.block_until_ready(ce_loss(a_bf, t_bf))
    ref_bf = jax.block_until_ready(
        ce_loss_ref(a_bf.astype(jnp.float32), t_bf.astype(jnp.float32)))
    assert jnp.allclose(loss_bf, ref_bf, rtol=1e-5, atol=1e-5), (loss_bf, ref_bf)

    # --- Case 4: larger bf16 batch -> auto-tiled into >= 8 pipelined tiles --
    B4, C4 = 256, 128
    a4 = jax.random.normal(k5, (B4, C4), dtype=jnp.bfloat16)
    t4 = jax.nn.softmax(
        jax.random.normal(k6, (B4, C4), dtype=jnp.float32), axis=1
    ).astype(jnp.bfloat16)
    loss4 = jax.block_until_ready(ce_loss(a4, t4))
    ref4 = jax.block_until_ready(
        ce_loss_ref(a4.astype(jnp.float32), t4.astype(jnp.float32)))
    assert jnp.allclose(loss4, ref4, rtol=1e-5, atol=1e-5), (loss4, ref4)

    print("KERNEL_OK")
</pallas_src>

<mosaic_0001>
module attributes {stable_mosaic.version = 11 : i64} {
  func.func @_ce_loss_kernel(%arg0: i32, %arg1: memref<8x32xf32, #tpu.memory_space<vmem>>, %arg2: memref<8x32xf32, #tpu.memory_space<vmem>>, %arg3: memref<1x8x128xf32, #tpu.memory_space<vmem>>) attributes {dimension_semantics = [#tpu.dimension_semantics<parallel>], iteration_bounds = array<i64: 1>, scalar_prefetch = 0 : i64, scratch_operands = 0 : i64, tpu.core_type = #tpu.core_type<tc>, window_params = [{transform_indices = @transform_0, window_bounds = array<i64: 8, 32>}, {transform_indices = @transform_1, window_bounds = array<i64: 8, 32>}, {transform_indices = @transform_2, window_bounds = array<i64: 1, 8, 128>}]} {
    %c0 = arith.constant 0 : index
    %c0_0 = arith.constant 0 : index
    %0 = vector.load %arg1[%c0, %c0_0] : memref<8x32xf32, #tpu.memory_space<vmem>>, vector<8x32xf32>
    %cst = arith.constant dense<0xFF800000> : vector<8xf32>
    %1 = vector.multi_reduction <maximumf>, %0, %cst [1] : vector<8x32xf32> to vector<8xf32>
    %2 = vector.shape_cast %1 : vector<8xf32> to vector<8x1xf32>
    %3 = vector.broadcast %2 : vector<8x1xf32> to vector<8x32xf32>
    %4 = arith.subf %0, %3 : vector<8x32xf32>
    %5 = math.exp %4 : vector<8x32xf32>
    %cst_1 = arith.constant dense<0.000000e+00> : vector<8xf32>
    %6 = vector.multi_reduction <add>, %5, %cst_1 [1] : vector<8x32xf32> to vector<8xf32>
    %7 = vector.shape_cast %6 : vector<8xf32> to vector<8x1xf32>
    %8 = math.log %7 : vector<8x1xf32>
    %cst_2 = arith.constant 9.99999997E-7 : f32
    %9 = vector.broadcast %cst_2 : f32 to vector<8x1xf32>
    %10 = arith.mulf %9, %7 : vector<8x1xf32>
    %11 = vector.broadcast %10 : vector<8x1xf32> to vector<8x32xf32>
    %12 = arith.addf %5, %11 : vector<8x32xf32>
    %13 = math.log %12 : vector<8x32xf32>
    %14 = vector.broadcast %8 : vector<8x1xf32> to vector<8x32xf32>
    %15 = arith.subf %13, %14 : vector<8x32xf32>
    %c0_3 = arith.constant 0 : index
    %c0_4 = arith.constant 0 : index
    %16 = vector.load %arg2[%c0_3, %c0_4] : memref<8x32xf32, #tpu.memory_space<vmem>>, vector<8x32xf32>
    %17 = arith.mulf %15, %16 : vector<8x32xf32>
    %cst_5 = arith.constant dense<0.000000e+00> : vector<8xf32>
    %18 = vector.multi_reduction <add>, %17, %cst_5 [1] : vector<8x32xf32> to vector<8xf32>
    %19 = vector.shape_cast %18 : vector<8xf32> to vector<8x1xf32>
    %20 = vector.shape_cast %19 : vector<8x1xf32> to vector<1x8x1xf32>
    %cst_6 = arith.constant dense<0.000000e+00> : vector<1xf32>
    %21 = vector.multi_reduction <add>, %20, %cst_6 [1, 2] : vector<1x8x1xf32> to vector<1xf32>
    %22 = vector.shape_cast %21 : vector<1xf32> to vector<1x1x1xf32>
    %23 = vector.extract %22[0, 0, 0] : f32 from vector<1x1x1xf32>
    %cst_7 = arith.constant 0.000000e+00 : f32
    %24 = arith.subf %cst_7, %23 : f32
    %25 = vector.broadcast %24 : f32 to vector<1x8x128xf32>
    %c0_8 = arith.constant 0 : index
    %c0_9 = arith.constant 0 : index
    %c0_10 = arith.constant 0 : index
    %26 = vector.load %arg3[%c0_8, %c0_9, %c0_10] : memref<1x8x128xf32, #tpu.memory_space<vmem>>, vector<1x8x128xf32>
    tpu.vector_store %arg3[%c0_8, %c0_9, %c0_10], %25 {strides = array<i32>} : memref<1x8x128xf32, #tpu.memory_space<vmem>>, vector<1x8x128xf32>,
    return
  }
  func.func @transform_0(%arg0: i32) -> (i32, i32) {
    %c0_i32 = arith.constant 0 : i32
    %c0_i32_0 = arith.constant 0 : i32
    return %arg0, %c0_i32 : i32, i32
  }
  func.func @transform_1(%arg0: i32) -> (i32, i32) {
    %c0_i32 = arith.constant 0 : i32
    %c0_i32_0 = arith.constant 0 : i32
    return %arg0, %c0_i32 : i32, i32
  }
  func.func @transform_2(%arg0: i32) -> (i32, i32, i32) {
    %c0_i32 = arith.constant 0 : i32
    %c0_i32_0 = arith.constant 0 : i32
    %c0_i32_1 = arith.constant 0 : i32
    return %arg0, %c0_i32, %c0_i32_0 : i32, i32, i32
  }
}

</mosaic_0001>

<bundles_post_ra>
// kernel: tpu_custom_call.1
= control target key start
LH: loop header
LB: loop body
LE: loop exit
PB: predicated region body
PF: predicated region fallthrough
CT: control target
= control target key end

     0   :  { %7 = vsyncpa [#allocation3], 0  ;;  %s229_s0 = inlined_call_operand.hbm [shape: f32[8,32], index: 0, kind: input, shape index: {}]   ;;  %s230_s1 = inlined_call_operand.hbm [shape: f32[8,32], index: 1, kind: input, shape index: {}]   ;;  %s231_s2 = inlined_call_operand.hbm [shape: f32[1,8,128], index: 2, kind: output, shape index: {}]  }
   0x1   :  { %8 = vsyncpa [#allocation6], 0 }
   0x2   :  { %9 = vsyncpa [#allocation4], 0  ;;  %s172_s9 = smov [#allocation2]   ;;  %s173_s11 = smov [#allocation5]  }
   0x3   :  { %s16_s10 = sshll.u32 %s172_s9, 4  ;;  %s26_s12 = sshll.u32 %s173_s11, 4  ;;  %s17_s10 = int_to_ptr.vmem [resolvable:$true] %s16_s10  ;;  %s27_s12 = int_to_ptr.vmem [resolvable:$true] %s26_s12 }
   0x4   :  { %s100_s15 = scalar_lea.hbm %s229_s0, 128 }
   0x5   :  { %p101_p0 = scmp.ne.s32.totalorder %s229_s0, %s100_s15  ;;  %p104_p1 = scmp.lt.u32.totalorder %s100_s15, %s229_s0 }
   0x7   :  { %p106_p2 = pnand %p104_p1, %p101_p0 }
   0x9   :  { %109 = shalt.err (!%p106_p2)
}
   0xa   :  { %s110_s20 = scalar_lea.vmem %s17_s10, 128  ;;  %p115_p4 = scmp.lt.s32.totalorder %s17_s10, %s17_s10 }
   0xb   :  { %p111_p3 = scmp.ne.s32.totalorder %s17_s10, %s110_s20  ;;  %p116_p5 = scmp.lt.s32.totalorder %s110_s20, %s110_s20 }
   0xd   :  { %p117_p6 = por %p116_p5, %p115_p4 }
   0xf   :  { %p118_p7 = pnand %p117_p6, %p111_p3 }
  0x11   :  { %121 = shalt.err (!%p118_p7)
}
  0x12   :  { %19 = dma.hbm_to_vmem [thread:$0]  %s229_s0, 128, %s17_s10, [#allocation3]  }
  0x13   :  { %s122_s25 = scalar_lea.hbm %s230_s1, 128 }
  0x14   :  { %p123_p8 = scmp.ne.s32.totalorder %s230_s1, %s122_s25  ;;  %p126_p9 = scmp.lt.u32.totalorder %s122_s25, %s230_s1 }
  0x16   :  { %p128_p10 = pnand %p126_p9, %p123_p8 }
  0x18   :  { %131 = shalt.err (!%p128_p10)
}
  0x19   :  { %s132_s30 = scalar_lea.vmem %s27_s12, 128  ;;  %p137_p12 = scmp.lt.s32.totalorder %s27_s12, %s27_s12 }
  0x1a   :  { %p133_p11 = scmp.ne.s32.totalorder %s27_s12, %s132_s30  ;;  %p138_p13 = scmp.lt.s32.totalorder %s132_s30, %s132_s30 }
  0x1c   :  { %p139_p0 = por %p138_p13, %p137_p12 }
  0x1e   :  { %p140_p1 = pnand %p139_p0, %p133_p11 }
  0x20   :  { %143 = shalt.err (!%p140_p1)
}
  0x21   :  { %29 = dma.hbm_to_vmem [thread:$0]  %s230_s1, 128, %s27_s12, [#allocation6]  }
  0x22   :  { %166 = dma.done.wait [#allocation3], 128  }
  0x23   :  { %167 = vsyncadd [#allocation3], 4294967168 }
  0x24   :  { %168 = dma.done.wait [#allocation6], 128  }
  0x25   :  { %169 = vsyncadd [#allocation6], 4294967168  ;;  %vm37_vm0 = vcmask 261120   ;;  %v36_v0 = vld [vmem:[#allocation2] sm:$0xff]  ;;  %v54_v14 = vld [vmem:[#allocation5] sm:$0xff]  ;;  %vm59_vm1 = vcmask 7168  }
  0x26   :  { %v38_v1 = vsel %vm37_vm0, %v36_v0, -inf  ;;  %s174_s1 = smov [#allocation7]  }
  0x27   :  { %39 = vmax.xlane.f32.xlu0 %v38_v1  ;;  %s79_s4 = sshll.u32 %s174_s1, 4  ;;  %s80_s4 = int_to_ptr.vmem [resolvable:$true] %s79_s4 }
  0x28   :  { %s144_s7 = scalar_lea.vmem %s80_s4, 128  ;;  %p149_p3 = scmp.lt.s32.totalorder %s80_s4, %s80_s4 }
  0x29   :  { %p145_p2 = scmp.ne.s32.totalorder %s80_s4, %s144_s7  ;;  %p150_p4 = scmp.lt.s32.totalorder %s144_s7, %s144_s7 }
  0x2b   :  { %p151_p5 = por %p150_p4, %p149_p3 }
  0x2d   :  { %p152_p6 = pnand %p151_p5, %p145_p2 }
  0xb4   :  { %v40_v2 = vpop.xlane.xlu0 %39 }
  0xb5   :  { %v41_v3 = vsub.f32 %v36_v0, %v40_v2 }
  0xb7   :  { %v42_v4 = vmul.f32 1.442695, %v41_v3 }
  0xb9   :  { %94 = vpow2.f32 %v42_v4 }
  0xc3   :  { %v95_v5 = vpop.eup %94 }
  0xc4   :  { %v44_v6 = vsel %vm37_vm0, %v95_v5, 0.0 }
  0xc5   :  { %45 = vadd.xlane.f32.xlu0 %v44_v6 }
 0x152   :  { %v46_v7 = vpop.xlane.xlu0 %45 }
 0x153   :  { %v49_v8 = vmul.f32 1e-06, %v46_v7  ;;  %96 = vlog2.f32 %v46_v7 }
 0x155   :  { %v50_v9 = vadd.f32 %v95_v5, %v49_v8 }
 0x157   :  { %98 = vlog2.f32 %v50_v9 }
 0x15d   :  { %v97_v10 = vpop.eup %96 }
 0x15e   :  { %v48_v12 = vmul.f32 0.6931472, %v97_v10 }
 0x161   :  { %v99_v11 = vpop.eup %98 }
 0x162   :  { %v52_v13 = vmul.f32 0.6931472, %v99_v11 }
 0x164   :  { %v53_v15 = vsub.f32 %v52_v13, %v48_v12 }
 0x166   :  { %v55_v16 = vmul.f32 %v54_v14, %v53_v15 }
 0x168   :  { %v56_v17 = vsel %vm37_vm0, %v55_v16, 0.0 }
 0x169   :  { %57 = vadd.xlane.f32.xlu1 %v56_v17 }
 0x1f6   :  { %v58_v18 = vpop.xlane.xlu1 %57 }
 0x1f7   :  { %v60_v19 = vsel %vm59_vm1, %v58_v18, 0.0 }
 0x1f8   :  { %61 = vadd.xlane.f32.xlu1 %v60_v19 }
 0x285   :  { %v62_v20 = vpop.xlane.xlu1 %61 }
 0x286   :  { %v63_v21 = vrot.slane %v62_v20, 4 }
 0x288   :  { %v64_v22 = vadd.f32 %v63_v21, %v62_v20 }
 0x28a   :  { %v65_v23 = vrot.slane %v64_v22, 2 }
 0x28c   :  { %v66_v24 = vadd.f32 %v65_v23, %v64_v22 }
 0x28e   :  { %v67_v25 = vrot.slane %v66_v24, 1 }
 0x290   :  { %v68_v26 = vadd.f32 %v67_v25, %v66_v24 }
 0x292   :  { %89 = vpush %v68_v26 }
 0x2c3   :  { %s90_s5 = spop %89 }
 0x2c4   :  { %s70_s6 = ssub.f32 0.0, %s90_s5 }
 0x2c6   :  { %v71_v27 = vstv %s70_s6 }
 0x2c7   :  { %72 = vst [vmem:[#allocation7] sm:$0xff] %v71_v27 }
 0x2c8   :  { %155 = shalt.err (!%p152_p6)
}
 0x2c9   :  { %s156_s10 = scalar_lea.hbm %s231_s2, 128 }
 0x2ca   :  { %p157_p7 = scmp.ne.s32.totalorder %s231_s2, %s156_s10  ;;  %p160_p8 = scmp.lt.u32.totalorder %s156_s10, %s231_s2 }
 0x2cc   :  { %p162_p9 = pnand %p160_p8, %p157_p7 }
 0x2ce   :  { %165 = shalt.err (!%p162_p9)
}
 0x2cf   :  { %82 = dma.vmem_to_hbm [thread:$0]  %s80_s4, 128, %s231_s2, [#allocation4]  }
 0x2d0   :  { %170 = dma.done.wait [#allocation4], 128  }
 0x2d1   :  { %171 = vsyncadd [#allocation4], 4294967168 }
 0x2d2   :  { %86 = vsyncpa [#allocation3], 1 }
 0x2d3   :  { %87 = vsyncpa [#allocation6], 1 }
 0x2d4   :  { %88 = vsyncpa [#allocation4], 1 }

</bundles_post_ra>
